<compile_context>
chip_gen: v6e
topology: v6e:2x2x1
jax: 0.10.0
libtpu: 0.0.40
codegen_flags: <defaults>
</compile_context>

<pallas_src>
import functools

import jax
import jax.numpy as jnp
from jax.experimental import pallas as pl
from jax.experimental.pallas import tpu as pltpu

_LANE = 128
_SUBLANE = 8


def _round_up(x, m):
    return ((x + m - 1) // m) * m


def _relation_kernel(x_ref, w1_ref, b1_ref, w2_ref, b2_ref, o_ref):
    # nn.ReLU() on the concatenated inputs. max(x, 0) commutes with the bf16
    # downcast, so applying it in the (possibly bf16) operand dtype is exact.
    x = jnp.maximum(x_ref[...], 0.0).astype(w1_ref.dtype)
    # Linear 1 (MXU, f32 accumulation) + bias (f32) + ReLU in f32.
    h = jnp.dot(x, w1_ref[...], preferred_element_type=jnp.float32)
    h = jnp.maximum(h + b1_ref[...], 0.0)
    # Linear 2 (MXU, f32 accumulation) + bias.
    o = jnp.dot(h.astype(w2_ref.dtype), w2_ref[...],
                preferred_element_type=jnp.float32) + b2_ref[...]
    o_ref[...] = o.astype(o_ref.dtype)


@functools.partial(jax.jit, static_argnames=("tm", "compute_dtype"))
def relation_forward(x, w1, b1, w2, b2, *, tm=None, compute_dtype=jnp.bfloat16):
    """Pallas implementation of Relation.forward.

    x : [..., num_inputs, in_features]
    w1: [num_inputs*in_features, bottleneck_dim]   (pre-transposed)
    b1: [bottleneck_dim]
    w2: [bottleneck_dim, out_features]             (pre-transposed)
    b2: [out_features]
    returns: [x.shape[0], -1, out_features] in x.dtype
    """
    num_inputs, in_features = x.shape[-2], x.shape[-1]
    flat_in = num_inputs * in_features
    bottleneck = w1.shape[1]
    out_features = w2.shape[1]
    out_dtype = x.dtype

    # Glue: flatten leading dims (the PyTorch .view(-1, num_inputs*in_features)).
    x2 = x.reshape(-1, flat_in).astype(compute_dtype)
    rows = x2.shape[0]

    # Lane-dense output: pad the (small) second-layer weights so the output
    # block's last dim is a multiple of 128 (unmasked full-lane stores).
    out_p = _round_up(out_features, _LANE)
    if out_p != out_features:
        w2 = jnp.pad(w2, ((0, 0), (0, out_p - out_features)))
        b2 = jnp.pad(b2, ((0, out_p - out_features),))

    w1c = w1.astype(compute_dtype)
    w2c = w2.astype(compute_dtype)
    b1_2d = b1.reshape(1, bottleneck).astype(jnp.float32)
    b2_2d = b2.reshape(1, out_p).astype(jnp.float32)

    compute_bytes = jnp.dtype(compute_dtype).itemsize
    out_bytes = jnp.dtype(out_dtype).itemsize

    def vmem_est(t):
        acts = 2 * t * flat_in * compute_bytes + 2 * t * out_p * out_bytes
        wts = 2 * (flat_in * bottleneck + bottleneck * out_p) * compute_bytes
        bias = 2 * (bottleneck + out_p) * 4
        live = t * bottleneck * 4 + t * out_p * 4   # f32 intermediates
        return acts + wts + bias + live

    # Row-tile selection: big tiles amortize per-step pipeline overhead and
    # feed the MXU a tall M operand; keep >= 2 grid steps when rows allow so
    # both v7x TensorCores get work; cap VMEM well under v7x's 64 MiB.
    if rows <= _SUBLANE:
        tm = rows                                   # single full block
    else:
        if tm is None:
            tm = min(512, max(_SUBLANE, _round_up(pl.cdiv(rows, 2), _SUBLANE)))
        tm = min(tm, _round_up(rows, _SUBLANE))
        vmem_budget = 48 * 1024 * 1024
        while tm > _SUBLANE and vmem_est(tm) > vmem_budget:
            tm = max(_SUBLANE, _round_up(tm // 2, _SUBLANE))

    grid = (pl.cdiv(rows, tm),)
    vmem_limit = int(min(max(vmem_est(tm) + (4 << 20), 32 << 20), 60 << 20))

    out = pl.pallas_call(
        _relation_kernel,
        out_shape=jax.ShapeDtypeStruct((rows, out_p), out_dtype),
        grid=grid,
        in_specs=[
            pl.BlockSpec((tm, flat_in), lambda i: (i, 0)),
            pl.BlockSpec((flat_in, bottleneck), lambda i: (0, 0)),
            pl.BlockSpec((1, bottleneck), lambda i: (0, 0)),
            pl.BlockSpec((bottleneck, out_p), lambda i: (0, 0)),
            pl.BlockSpec((1, out_p), lambda i: (0, 0)),
        ],
        out_specs=pl.BlockSpec((tm, out_p), lambda i: (i, 0)),
        compiler_params=pltpu.CompilerParams(
            dimension_semantics=("parallel",),
            vmem_limit_bytes=vmem_limit,
        ),
    )(x2, w1c, b1_2d, w2c, b2_2d)

    if out_p != out_features:
        out = out[:, :out_features]
    # Final .view(input.size(0), -1, out_features)
    return out.reshape(x.shape[0], -1, out_features)


def init_relation_params(key, num_inputs, in_features, out_features,
                         bottleneck_dim=512, dtype=jnp.float32):
    """PyTorch-style uniform(+/- 1/sqrt(fan_in)) init; weights pre-transposed."""
    flat_in = num_inputs * in_features
    k1, k2, k3, k4 = jax.random.split(key, 4)
    bound1 = 1.0 / (flat_in ** 0.5)
    bound2 = 1.0 / (bottleneck_dim ** 0.5)
    w1 = jax.random.uniform(k1, (flat_in, bottleneck_dim), dtype, -bound1, bound1)
    b1 = jax.random.uniform(k2, (bottleneck_dim,), dtype, -bound1, bound1)
    w2 = jax.random.uniform(k3, (bottleneck_dim, out_features), dtype, -bound2, bound2)
    b2 = jax.random.uniform(k4, (out_features,), dtype, -bound2, bound2)
    return w1, b1, w2, b2


def _reference_forward(x, w1, b1, w2, b2):
    out_features = w2.shape[1]
    flat_in = x.shape[-2] * x.shape[-1]
    x2 = x.reshape(-1, flat_in).astype(jnp.float32)
    h = jnp.maximum(jnp.maximum(x2, 0.0) @ w1 + b1, 0.0)
    o = h @ w2 + b2
    return o.reshape(x.shape[0], -1, out_features)


if __name__ == "__main__":
    key = jax.random.PRNGKey(0)

    # Case 1: batch=2, seq=4, num_inputs=4 frames, in_features=32; f32 compute
    # for a tight numerical check against the reference MLP.
    batch, seq, num_inputs, in_features = 2, 4, 4, 32
    out_features, bottleneck_dim = 64, 128
    kx, kp, key = jax.random.split(key, 3)
    x = jax.random.normal(kx, (batch, seq, num_inputs, in_features), jnp.float32)
    w1, b1, w2, b2 = init_relation_params(
        kp, num_inputs, in_features, out_features, bottleneck_dim)
    out = jax.block_until_ready(
        relation_forward(x, w1, b1, w2, b2, compute_dtype=jnp.float32))
    ref = _reference_forward(x, w1, b1, w2, b2)
    assert out.shape == (batch, seq, out_features), out.shape
    assert jnp.allclose(out, ref, atol=1e-4, rtol=1e-4), "f32 mismatch vs reference"

    # Case 2: default bf16 matmul operands (f32 accumulation) with ragged rows
    # and non-128 out_features, exercising partial final block + lane padding.
    batch2, seq2, num_inputs2, in_features2 = 3, 5, 4, 24
    out_features2, bottleneck2 = 96, 160
    kx2, kp2, _ = jax.random.split(key, 3)
    x_b = jax.random.normal(kx2, (batch2, seq2, num_inputs2, in_features2),
                            jnp.float32)
    params2 = init_relation_params(
        kp2, num_inputs2, in_features2, out_features2, bottleneck2)
    out2 = jax.block_until_ready(relation_forward(x_b, *params2))
    ref2 = _reference_forward(x_b, *params2)
    assert out2.shape == (batch2, seq2, out_features2), out2.shape
    assert jnp.allclose(out2, ref2, atol=3e-2, rtol=3e-2), "bf16 mismatch vs reference"

    print("KERNEL_OK")
</pallas_src>

<mosaic_0001>
module attributes {stable_mosaic.version = 11 : i64} {
  func.func @_relation_kernel(%arg0: i32, %arg1: memref<8x128xf32, #tpu.memory_space<vmem>>, %arg2: memref<128x128xf32, #tpu.memory_space<vmem>>, %arg3: memref<1x128xf32, #tpu.memory_space<vmem>>, %arg4: memref<128x128xf32, #tpu.memory_space<vmem>>, %arg5: memref<1x128xf32, #tpu.memory_space<vmem>>, %arg6: memref<8x128xf32, #tpu.memory_space<vmem>>) attributes {dimension_semantics = [#tpu.dimension_semantics<parallel>], iteration_bounds = array<i64: 1>, scalar_prefetch = 0 : i64, scratch_operands = 0 : i64, tpu.core_type = #tpu.core_type<tc>, window_params = [{transform_indices = @transform_0, window_bounds = array<i64: 8, 128>}, {pipeline_mode = #tpu.pipeline_mode<synchronous>, transform_indices = @transform_1, window_bounds = array<i64: 128, 128>}, {pipeline_mode = #tpu.pipeline_mode<synchronous>, transform_indices = @transform_2, window_bounds = array<i64: 1, 128>}, {pipeline_mode = #tpu.pipeline_mode<synchronous>, transform_indices = @transform_3, window_bounds = array<i64: 128, 128>}, {pipeline_mode = #tpu.pipeline_mode<synchronous>, transform_indices = @transform_4, window_bounds = array<i64: 1, 128>}, {transform_indices = @transform_5, window_bounds = array<i64: 8, 128>}]} {
    %c0 = arith.constant 0 : index
    %c0_0 = arith.constant 0 : index
    %0 = vector.load %arg1[%c0, %c0_0] : memref<8x128xf32, #tpu.memory_space<vmem>>, vector<8x128xf32>
    %cst = arith.constant 0.000000e+00 : f32
    %1 = vector.broadcast %cst : f32 to vector<8x128xf32>
    %2 = arith.maximumf %0, %1 : vector<8x128xf32>
    %c0_1 = arith.constant 0 : index
    %c0_2 = arith.constant 0 : index
    %3 = vector.load %arg2[%c0_1, %c0_2] : memref<128x128xf32, #tpu.memory_space<vmem>>, vector<128x128xf32>
    %cst_3 = arith.constant dense<0.000000e+00> : vector<8x128xf32>
    %4 = tpu.matmul %2, %3, %cst_3 {dimension_numbers = #tpu.dot_dimension_numbers<[1], [0], [0], [1], [0, 0, 1, 1], [], []>} : vector<8x128xf32>, vector<128x128xf32>, vector<8x128xf32> -> vector<8x128xf32>
    %c0_4 = arith.constant 0 : index
    %c0_5 = arith.constant 0 : index
    %5 = vector.load %arg3[%c0_4, %c0_5] : memref<1x128xf32, #tpu.memory_space<vmem>>, vector<1x128xf32>
    %6 = vector.broadcast %5 : vector<1x128xf32> to vector<8x128xf32>
    %7 = arith.addf %4, %6 : vector<8x128xf32>
    %cst_6 = arith.constant 0.000000e+00 : f32
    %8 = vector.broadcast %cst_6 : f32 to vector<8x128xf32>
    %9 = arith.maximumf %7, %8 : vector<8x128xf32>
    %c0_7 = arith.constant 0 : index
    %c0_8 = arith.constant 0 : index
    %10 = vector.load %arg4[%c0_7, %c0_8] : memref<128x128xf32, #tpu.memory_space<vmem>>, vector<128x128xf32>
    %cst_9 = arith.constant dense<0.000000e+00> : vector<8x128xf32>
    %11 = tpu.matmul %9, %10, %cst_9 {dimension_numbers = #tpu.dot_dimension_numbers<[1], [0], [0], [1], [0, 0, 1, 1], [], []>} : vector<8x128xf32>, vector<128x128xf32>, vector<8x128xf32> -> vector<8x128xf32>
    %c0_10 = arith.constant 0 : index
    %c0_11 = arith.constant 0 : index
    %12 = vector.load %arg5[%c0_10, %c0_11] : memref<1x128xf32, #tpu.memory_space<vmem>>, vector<1x128xf32>
    %13 = vector.broadcast %12 : vector<1x128xf32> to vector<8x128xf32>
    %14 = arith.addf %11, %13 : vector<8x128xf32>
    %c0_12 = arith.constant 0 : index
    %c0_13 = arith.constant 0 : index
    %15 = vector.load %arg6[%c0_12, %c0_13] : memref<8x128xf32, #tpu.memory_space<vmem>>, vector<8x128xf32>
    tpu.vector_store %arg6[%c0_12, %c0_13], %14 {strides = array<i32>} : memref<8x128xf32, #tpu.memory_space<vmem>>, vector<8x128xf32>,
    return
  }
  func.func @transform_0(%arg0: i32) -> (i32, i32) {
    %c0_i32 = arith.constant 0 : i32
    %c0_i32_0 = arith.constant 0 : i32
    return %arg0, %c0_i32 : i32, i32
  }
  func.func @transform_1(%arg0: i32) -> (i32, i32) {
    %c0_i32 = arith.constant 0 : i32
    %c0_i32_0 = arith.constant 0 : i32
    %c0_i32_1 = arith.constant 0 : i32
    return %c0_i32, %c0_i32_0 : i32, i32
  }
  func.func @transform_2(%arg0: i32) -> (i32, i32) {
    %c0_i32 = arith.constant 0 : i32
    %c0_i32_0 = arith.constant 0 : i32
    %c0_i32_1 = arith.constant 0 : i32
    return %c0_i32, %c0_i32_0 : i32, i32
  }
  func.func @transform_3(%arg0: i32) -> (i32, i32) {
    %c0_i32 = arith.constant 0 : i32
    %c0_i32_0 = arith.constant 0 : i32
    %c0_i32_1 = arith.constant 0 : i32
    return %c0_i32, %c0_i32_0 : i32, i32
  }
  func.func @transform_4(%arg0: i32) -> (i32, i32) {
    %c0_i32 = arith.constant 0 : i32
    %c0_i32_0 = arith.constant 0 : i32
    %c0_i32_1 = arith.constant 0 : i32
    return %c0_i32, %c0_i32_0 : i32, i32
  }
  func.func @transform_5(%arg0: i32) -> (i32, i32) {
    %c0_i32 = arith.constant 0 : i32
    %c0_i32_0 = arith.constant 0 : i32
    return %arg0, %c0_i32 : i32, i32
  }
}

</mosaic_0001>

<bundles_post_ra>
// kernel: relation_forward.1
= control target key start
LH: loop header
LB: loop body
LE: loop exit
PB: predicated region body
PF: predicated region fallthrough
CT: control target
= control target key end

     0   :  { %v356_v1 = vmov 0.0   ;;  %vm357_vm0 = vmmov 0   ;;  %s531_s0 = inlined_call_operand.vmem [shape: f32[8,128], index: 0, kind: input, shape index: {}]   ;;  %s532_s1 = inlined_call_operand.vmem [shape: f32[128,128], index: 1, kind: input, shape index: {}]   ;;  %s533_s2 = inlined_call_operand.vmem [shape: f32[1,128], index: 2, kind: input, shape index: {}]   ;;  %s534_s3 = inlined_call_operand.vmem [shape: f32[128,128], index: 3, kind: input, shape index: {}]   ;;  %s535_s4 = inlined_call_operand.vmem [shape: f32[1,128], index: 4, kind: input, shape index: {}]   ;;  %s536_s5 = inlined_call_operand.hbm [shape: f32[8,128], index: 5, kind: output, shape index: {}]  }
   0x1   :  { %v38_v0 = vld [vmem:[%s532_s1 + $0x78] sm:$0xff]  ;;  %261 = vmatprep.subr.mxu0 %v356_v1  ;;  %v37_v2 = vld [vmem:[%s532_s1 + $0x70] sm:$0xff]  ;;  %293 = vmatprep.mubr.msk.f32.mxu0 %vm357_vm0, %v356_v1  ;;  %v36_v3 = vld [vmem:[%s532_s1 + $0x68] sm:$0xff] }
   0x2   :  { %262 = vmatpush3.msra.mxu0 %v38_v0  ;;  %296 = vmatprep.subr.mxu1 %v356_v1  ;;  %v35_v4 = vld [vmem:[%s532_s1 + $0x60] sm:$0xff]  ;;  %v132_v5 = vld [vmem:[%s534_s3 + $0x78] sm:$0xff]  ;;  %v131_v6 = vld [vmem:[%s534_s3 + $0x70] sm:$0xff] }
   0x3   :  { %263 = vmatprep.subr.mxu0 %v356_v1  ;;  %328 = vmatprep.mubr.msk.f32.mxu1 %vm357_vm0, %v356_v1  ;;  %v34_v7 = vld [vmem:[%s532_s1 + $0x58] sm:$0xff]  ;;  %v130_v8 = vld [vmem:[%s534_s3 + $0x68] sm:$0xff]  ;;  %v33_v9 = vld [vmem:[%s532_s1 + $0x50] sm:$0xff] }
   0x4   :  { %264 = vmatpush3.msra.mxu0 %v37_v2  ;;  %297 = vmatpush3.msra.mxu1 %v132_v5  ;;  %v129_v10 = vld [vmem:[%s534_s3 + $0x60] sm:$0xff] }
   0x5   :  { %265 = vmatprep.subr.mxu0 %v356_v1  ;;  %298 = vmatprep.subr.mxu1 %v356_v1 }
   0x6   :  { %266 = vmatpush3.msra.mxu0 %v36_v3  ;;  %299 = vmatpush3.msra.mxu1 %v131_v6 }
   0x7   :  { %267 = vmatprep.subr.mxu0 %v356_v1  ;;  %300 = vmatprep.subr.mxu1 %v356_v1 }
   0x8   :  { %268 = vmatpush3.msra.mxu0 %v35_v4  ;;  %301 = vmatpush3.msra.mxu1 %v130_v8 }
   0x9   :  { %269 = vmatprep.subr.mxu0 %v356_v1 }
   0xa   :  { %270 = vmatpush3.msra.mxu0 %v34_v7 }
   0xb   :  { %10 = vsyncpa [#allocation3], 0  ;;  %271 = vmatprep.subr.mxu0 %v356_v1  ;;  %v32_v11 = vld [vmem:[%s532_s1 + $0x48] sm:$0xff]  ;;  %302 = vmatprep.subr.mxu1 %v356_v1  ;;  %v128_v12 = vld [vmem:[%s534_s3 + $0x58] sm:$0xff]  ;;  %s358_s11 = smov [#allocation2]  }
   0xc   :  { %272 = vmatpush3.msra.mxu0 %v33_v9  ;;  %303 = vmatpush3.msra.mxu1 %v129_v10  ;;  %v31_v13 = vld [vmem:[%s532_s1 + $0x40] sm:$0xff]  ;;  %v127_v14 = vld [vmem:[%s534_s3 + $0x50] sm:$0xff]  ;;  %v30_v15 = vld [vmem:[%s532_s1 + $0x38] sm:$0xff]  ;;  %s217_s12 = sshll.u32 %s358_s11, 4  ;;  %s218_s12 = int_to_ptr.vmem [resolvable:$true] %s217_s12 }
   0xd   :  { %273 = vmatprep.subr.mxu0 %v356_v1  ;;  %304 = vmatprep.subr.mxu1 %v356_v1  ;;  %v126_v16 = vld [vmem:[%s534_s3 + $0x48] sm:$0xff]  ;;  %v29_v17 = vld [vmem:[%s532_s1 + $0x30] sm:$0xff]  ;;  %v125_v18 = vld [vmem:[%s534_s3 + $0x40] sm:$0xff]  ;;  %p339_p1 = scmp.lt.s32.totalorder %s218_s12, %s218_s12 }
   0xe   :  { %274 = vmatpush3.msra.mxu0 %v32_v11  ;;  %305 = vmatpush3.msra.mxu1 %v128_v12  ;;  %v28_v19 = vld [vmem:[%s532_s1 + $0x28] sm:$0xff]  ;;  %v124_v20 = vld [vmem:[%s534_s3 + $0x38] sm:$0xff]  ;;  %v27_v21 = vld [vmem:[%s532_s1 + $0x20] sm:$0xff] }
   0xf   :  { %275 = vmatprep.subr.mxu0 %v356_v1  ;;  %306 = vmatprep.subr.mxu1 %v356_v1  ;;  %v123_v22 = vld [vmem:[%s534_s3 + $0x30] sm:$0xff]  ;;  %v26_v23 = vld [vmem:[%s532_s1 + $0x18] sm:$0xff]  ;;  %v122_v24 = vld [vmem:[%s534_s3 + $0x28] sm:$0xff] }
  0x10   :  { %276 = vmatpush3.msra.mxu0 %v31_v13  ;;  %307 = vmatpush3.msra.mxu1 %v127_v14  ;;  %v25_v25 = vld [vmem:[%s532_s1 + $0x10] sm:$0xff]  ;;  %v121_v26 = vld [vmem:[%s534_s3 + $0x20] sm:$0xff]  ;;  %v24_v28 = vld [vmem:[%s532_s1 + $0x8] sm:$0xff] }
  0x11   :  { %277 = vmatprep.subr.mxu0 %v356_v1  ;;  %308 = vmatprep.subr.mxu1 %v356_v1  ;;  %v21_v27 = vld [vmem:[%s531_s0] sm:$0xff]  ;;  %v120_v29 = vld [vmem:[%s534_s3 + $0x18] sm:$0xff]  ;;  %v119_v32 = vld [vmem:[%s534_s3 + $0x10] sm:$0xff] }
  0x12   :  { %278 = vmatpush3.msra.mxu0 %v30_v15  ;;  %309 = vmatpush3.msra.mxu1 %v126_v16  ;;  %v23_v30 = vld [vmem:[%s532_s1] sm:$0xff]  ;;  %v22_v31 = vmax.f32 %v21_v27, 0.0  ;;  %v118_v33 = vld [vmem:[%s534_s3 + $0x8] sm:$0xff] }
  0x13   :  { %279 = vmatprep.subr.mxu0 %v356_v1  ;;  %310 = vmatprep.subr.mxu1 %v356_v1  ;;  %v117_v34 = vld [vmem:[%s534_s3] sm:$0xff]  ;;  %s334_s3 = scalar_lea.vmem %s218_s12, 128 }
  0x14   :  { %280 = vmatpush3.msra.mxu0 %v29_v17  ;;  %311 = vmatpush3.msra.mxu1 %v125_v18  ;;  %v225_v35 = vld [vmem:[%s533_s2] ss:$0 sm:$0xff]  ;;  %p335_p0 = scmp.ne.s32.totalorder %s218_s12, %s334_s3  ;;  %p340_p2 = scmp.lt.s32.totalorder %s334_s3, %s334_s3 }
  0x15   :  { %281 = vmatprep.subr.mxu0 %v356_v1  ;;  %312 = vmatprep.subr.mxu1 %v356_v1  ;;  %v226_v40 = vld [vmem:[%s535_s4] ss:$0 sm:$0xff] }
  0x16   :  { %282 = vmatpush3.msra.mxu0 %v28_v19  ;;  %313 = vmatpush3.msra.mxu1 %v124_v20  ;;  %p341_p3 = por %p340_p2, %p339_p1 }
  0x17   :  { %283 = vmatprep.subr.mxu0 %v356_v1  ;;  %314 = vmatprep.subr.mxu1 %v356_v1 }
  0x18   :  { %284 = vmatpush3.msra.mxu0 %v27_v21  ;;  %315 = vmatpush3.msra.mxu1 %v123_v22  ;;  %p342_p4 = pnand %p341_p3, %p335_p0 }
  0x19   :  { %285 = vmatprep.subr.mxu0 %v356_v1  ;;  %316 = vmatprep.subr.mxu1 %v356_v1 }
  0x1a   :  { %286 = vmatpush3.msra.mxu0 %v26_v23  ;;  %317 = vmatpush3.msra.mxu1 %v122_v24 }
  0x1b   :  { %287 = vmatprep.subr.mxu0 %v356_v1  ;;  %318 = vmatprep.subr.mxu1 %v356_v1 }
  0x1c   :  { %288 = vmatpush3.msra.mxu0 %v25_v25  ;;  %319 = vmatpush3.msra.mxu1 %v121_v26 }
  0x1d   :  { %289 = vmatprep.subr.mxu0 %v356_v1  ;;  %320 = vmatprep.subr.mxu1 %v356_v1 }
  0x1e   :  { %290 = vmatpush3.msra.mxu0 %v24_v28  ;;  %321 = vmatpush3.msra.mxu1 %v120_v29 }
  0x1f   :  { %291 = vmatprep.subr.mxu0 %v356_v1  ;;  %322 = vmatprep.subr.mxu1 %v356_v1 }
  0x20   :  { %292 = vmatpush3.msra.mxu0 %v23_v30  ;;  %323 = vmatpush3.msra.mxu1 %v119_v32 }
  0x21   :  { %294 = vmatmul.mubr.f32.vlgmr.msra.gmra.mxu0 %v22_v31  ;;  %324 = vmatprep.subr.mxu1 %v356_v1 }
  0x22   :  { %325 = vmatpush3.msra.mxu1 %v118_v33 }
  0x23   :  { %326 = vmatprep.subr.mxu1 %v356_v1 }
  0x24   :  { %327 = vmatpush3.msra.mxu1 %v117_v34 }
  0xe1   :  { %v112_v36 = vpop.f32.mrf.mxu0 }
  0xe2   :  { %v113_v37 = vadd.f32 %v225_v35, %v112_v36 }
  0xe3   :  { %v295_v38 = vpop.f32.mrf.mxu0 }
  0xe4   :  { %v116_v39 = vmax.f32 %v113_v37, 0.0 }
  0xe6   :  { %329 = vmatmul.mubr.f32.vlgmr.msra.gmra.mxu1 %v116_v39 }
 0x1a6   :  { %v206_v41 = vpop.f32.mrf.mxu1 }
 0x1a7   :  { %v207_v42 = vadd.f32 %v226_v40, %v206_v41 }
 0x1a8   :  { %v330_v43 = vpop.f32.mrf.mxu1 }
 0x1a9   :  { %210 = vst [vmem:[#allocation2] sm:$0xff] %v207_v42 }
 0x1aa   :  { %345 = shalt.err (!%p342_p4)
}
 0x1ab   :  { %220 = dma.vmem_to_hbm [thread:$0]  %s218_s12, 128, %s536_s5, [#allocation3]  }
 0x1ac   :  { %354 = dma.done.wait [#allocation3], 128  }
 0x1ad   :  { %355 = vsyncadd [#allocation3], 4294967168 }
 0x1ae   :  { %224 = vsyncpa [#allocation3], 1 }

</bundles_post_ra>
